<compile_context>
chip_gen: v7x
topology: tpu7x:2x2x1
jax: 0.10.0
libtpu: 0.0.40
codegen_flags: <defaults>
</compile_context>

<pallas_src>
import functools
import math

import jax
import jax.numpy as jnp
from jax.experimental import pallas as pl
from jax.experimental.pallas import tpu as pltpu


def _round_up(x, m):
    return ((x + m - 1) // m) * m


# --------------------------------------------------------------------------
# Kernel 1: feature transform  XW = X @ W   (contraction dim kept resident)
# --------------------------------------------------------------------------
def _feature_transform_kernel(x_ref, w_ref, o_ref):
    o_ref[...] = jnp.dot(
        x_ref[...], w_ref[...], preferred_element_type=jnp.float32
    ).astype(o_ref.dtype)


def feature_transform(x, w, *, tile_m, out_dtype=jnp.bfloat16):
    """x: [Np, Fp] bf16, w: [Fp, Hp] bf16 -> [Np, Hp] out_dtype."""
    m, f = x.shape
    _, h = w.shape
    assert m % tile_m == 0
    out_isz = jnp.dtype(out_dtype).itemsize
    tile_bytes = (2 * tile_m * f * 2          # double-buffered x tile (bf16)
                  + f * h * 2                 # resident weight (bf16)
                  + 2 * tile_m * h * out_isz) # double-buffered output tile
    return pl.pallas_call(
        _feature_transform_kernel,
        out_shape=jax.ShapeDtypeStruct((m, h), out_dtype),
        grid_spec=pltpu.PrefetchScalarGridSpec(
            num_scalar_prefetch=0,
            grid=(m // tile_m,),
            in_specs=[
                pl.BlockSpec((tile_m, f), lambda i: (i, 0)),
                pl.BlockSpec((f, h), lambda i: (0, 0)),
            ],
            out_specs=pl.BlockSpec((tile_m, h), lambda i: (i, 0)),
        ),
        compiler_params=pltpu.CompilerParams(
            dimension_semantics=("parallel",),
            vmem_limit_bytes=max(4 * tile_bytes, 32 * 1024 * 1024),
        ),
    )(x, w)


# --------------------------------------------------------------------------
# Kernel 2: tiled aggregation  Y = A_hat @ XW + b   (optional ReLU)
# --------------------------------------------------------------------------
def _aggregate_kernel(adj_ref, xw_ref, b_ref, o_ref, acc_ref, *, apply_relu):
    k = pl.program_id(1)

    @pl.when(k == 0)
    def _():
        acc_ref[...] = jnp.zeros_like(acc_ref)

    acc_ref[...] += jnp.dot(
        adj_ref[...], xw_ref[...], preferred_element_type=jnp.float32
    )

    @pl.when(k == pl.num_programs(1) - 1)
    def _():
        y = acc_ref[...] + b_ref[...].astype(jnp.float32)
        if apply_relu:
            y = jnp.maximum(y, 0.0)
        o_ref[...] = y.astype(o_ref.dtype)


def aggregate(adj, xw, b, *, tile_m, tile_k, apply_relu, out_dtype):
    """adj: [Np, Np] bf16, xw: [Np, Hp] bf16, b: [Hp] f32 -> [Np, Hp]."""
    n, _ = adj.shape
    h = xw.shape[1]
    assert n % tile_m == 0 and n % tile_k == 0
    out_isz = jnp.dtype(out_dtype).itemsize
    tile_bytes = (2 * tile_m * tile_k * 2     # double-buffered adj tile (bf16)
                  + 2 * tile_k * h * 2        # double-buffered xw tile  (bf16)
                  + 2 * tile_m * h * out_isz  # double-buffered output tile
                  + tile_m * h * 4            # f32 accumulator scratch
                  + h * 4)                    # bias
    kernel = functools.partial(_aggregate_kernel, apply_relu=apply_relu)
    return pl.pallas_call(
        kernel,
        out_shape=jax.ShapeDtypeStruct((n, h), out_dtype),
        grid_spec=pltpu.PrefetchScalarGridSpec(
            num_scalar_prefetch=0,
            grid=(n // tile_m, n // tile_k),
            in_specs=[
                pl.BlockSpec((tile_m, tile_k), lambda i, k: (i, k)),
                pl.BlockSpec((tile_k, h), lambda i, k: (k, 0)),
                pl.BlockSpec((1, h), lambda i, k: (0, 0)),
            ],
            out_specs=pl.BlockSpec((tile_m, h), lambda i, k: (i, 0)),
            scratch_shapes=[pltpu.VMEM((tile_m, h), jnp.float32)],
        ),
        compiler_params=pltpu.CompilerParams(
            dimension_semantics=("parallel", "arbitrary"),
            vmem_limit_bytes=max(4 * tile_bytes, 32 * 1024 * 1024),
        ),
    )(adj, xw, b.reshape(1, -1))


# --------------------------------------------------------------------------
# Full 2-layer GCN forward
# --------------------------------------------------------------------------
def gcn_forward(adj, x, w1, b1, w2, b2, *, tile_m=512, tile_k=512):
    """adj: dense normalized [N, N] f32; x: [N, F] f32; returns [N, H2] f32."""
    n, f = x.shape
    h1 = w1.shape[1]
    h2 = w2.shape[1]

    # Lane-dense padding of all feature/hidden dims; 128-aligned node dim.
    fp = _round_up(f, 128)
    h1p = _round_up(h1, 128)
    h2p = _round_up(h2, 128)
    np0 = _round_up(n, 128)
    tm = min(tile_m, np0)
    tk = min(tile_k, np0)
    npad = _round_up(np0, math.lcm(tm, tk))

    pad2 = lambda a, r, c: jnp.pad(a, ((0, r - a.shape[0]), (0, c - a.shape[1])))

    adj_bf = pad2(adj, npad, npad).astype(jnp.bfloat16)
    x_bf = pad2(x, npad, fp).astype(jnp.bfloat16)
    w1_bf = pad2(w1, fp, h1p).astype(jnp.bfloat16)
    w2_bf = pad2(w2, h1p, h2p).astype(jnp.bfloat16)
    b1_p = jnp.pad(b1.astype(jnp.float32), (0, h1p - h1))
    b2_p = jnp.pad(b2.astype(jnp.float32), (0, h2p - h2))

    # ---- layer 1: H = relu(A_hat @ (X @ W1) + b1) ----
    xw1 = feature_transform(x_bf, w1_bf, tile_m=tm, out_dtype=jnp.bfloat16)
    h = aggregate(adj_bf, xw1, b1_p, tile_m=tm, tile_k=tk,
                  apply_relu=True, out_dtype=jnp.bfloat16)

    # F.dropout(x, training=self.training): identity in eval mode.
    # TODO(synk): training-mode dropout (p=0.5) via pltpu.prng_seed/prng_random_bits.

    # ---- layer 2: OUT = A_hat @ (H @ W2) + b2 ----
    xw2 = feature_transform(h, w2_bf, tile_m=tm, out_dtype=jnp.bfloat16)
    out_p = aggregate(adj_bf, xw2, b2_p, tile_m=tm, tile_k=tk,
                      apply_relu=False, out_dtype=jnp.float32)

    return out_p[:n, :h2]


# --------------------------------------------------------------------------
# Graph normalization (plain JAX preprocessing, matches GCNConv)
# --------------------------------------------------------------------------
def normalized_adjacency(edge_index, edge_weight, num_nodes):
    """Dense D^{-1/2}(A+I)D^{-1/2}; A_hat[t, s] = norm weight of edge s->t."""
    src, tgt = edge_index[0], edge_index[1]
    loop = jnp.arange(num_nodes, dtype=edge_index.dtype)
    src = jnp.concatenate([src, loop])
    tgt = jnp.concatenate([tgt, loop])
    w = jnp.concatenate(
        [edge_weight.astype(jnp.float32),
         jnp.ones((num_nodes,), jnp.float32)])           # self-loop fill value 1
    a = jnp.zeros((num_nodes, num_nodes), jnp.float32).at[tgt, src].add(w)
    deg = a.sum(axis=1)                                  # deg per target node
    dis = jnp.where(deg > 0.0, 1.0 / jnp.sqrt(deg), 0.0)
    return dis[:, None] * a * dis[None, :]


def glorot(key, fan_in, fan_out):
    limit = jnp.sqrt(6.0 / (fan_in + fan_out))
    return jax.random.uniform(key, (fan_in, fan_out), jnp.float32, -limit, limit)


if __name__ == "__main__":
    # Small synthetic graph consistent with the module:
    #   N nodes, num_features, hidden_channels, E directed edges.
    N, NUM_FEATURES, HIDDEN, E = 16, 8, 32, 40

    key = jax.random.PRNGKey(0)
    k_x, k_src, k_tgt, k_w, k_w1, k_w2 = jax.random.split(key, 6)

    x = jax.random.normal(k_x, (N, NUM_FEATURES), jnp.float32)
    edge_index = jnp.stack([
        jax.random.randint(k_src, (E,), 0, N),
        jax.random.randint(k_tgt, (E,), 0, N),
    ]).astype(jnp.int32)                                 # [2, E]
    edge_weight = jax.random.uniform(k_w, (E,), jnp.float32, 0.1, 1.0)

    # Deterministic parameters (GCNConv: glorot weights, zero bias).
    w1 = glorot(k_w1, NUM_FEATURES, HIDDEN)
    b1 = jnp.zeros((HIDDEN,), jnp.float32)
    w2 = glorot(k_w2, HIDDEN, HIDDEN)
    b2 = jnp.zeros((HIDDEN,), jnp.float32)

    adj = normalized_adjacency(edge_index, edge_weight, N)

    out = gcn_forward(adj, x, w1, b1, w2, b2)
    out = jax.block_until_ready(out)

    # Plain-JAX reference (inputs rounded to bf16 to mirror the kernel's
    # boundary casts; dots/accumulation in f32).
    r = lambda a: a.astype(jnp.bfloat16).astype(jnp.float32)
    ref_h = jnp.maximum(r(adj) @ (r(x) @ r(w1)) + b1[None, :], 0.0)
    ref = r(adj) @ (r(ref_h) @ r(w2)) + b2[None, :]
    assert out.shape == (N, HIDDEN)
    assert jnp.allclose(out, ref, atol=5e-2, rtol=5e-2), (
        float(jnp.max(jnp.abs(out - ref))))

    print("KERNEL_OK")
</pallas_src>

<mosaic_0001>
module attributes {stable_mosaic.version = 11 : i64} {
  func.func @_feature_transform_kernel(%arg0: i32, %arg1: memref<128x128xbf16, #tpu.memory_space<vmem>>, %arg2: memref<128x128xbf16, #tpu.memory_space<vmem>>, %arg3: memref<128x128xbf16, #tpu.memory_space<vmem>>) attributes {dimension_semantics = [#tpu.dimension_semantics<parallel>], iteration_bounds = array<i64: 1>, scalar_prefetch = 0 : i64, scratch_operands = 0 : i64, tpu.core_type = #tpu.core_type<tc>, window_params = [{transform_indices = @transform_0, window_bounds = array<i64: 128, 128>}, {pipeline_mode = #tpu.pipeline_mode<synchronous>, transform_indices = @transform_1, window_bounds = array<i64: 128, 128>}, {transform_indices = @transform_2, window_bounds = array<i64: 128, 128>}]} {
    %c0 = arith.constant 0 : index
    %c0_0 = arith.constant 0 : index
    %0 = vector.load %arg1[%c0, %c0_0] : memref<128x128xbf16, #tpu.memory_space<vmem>>, vector<128x128xbf16>
    %c0_1 = arith.constant 0 : index
    %c0_2 = arith.constant 0 : index
    %1 = vector.load %arg2[%c0_1, %c0_2] : memref<128x128xbf16, #tpu.memory_space<vmem>>, vector<128x128xbf16>
    %cst = arith.constant dense<0.000000e+00> : vector<128x128xf32>
    %2 = tpu.matmul %0, %1, %cst {dimension_numbers = #tpu.dot_dimension_numbers<[1], [0], [0], [1], [0, 0, 1, 1], [], []>} : vector<128x128xbf16>, vector<128x128xbf16>, vector<128x128xf32> -> vector<128x128xf32>
    %3 = arith.truncf %2 : vector<128x128xf32> to vector<128x128xbf16>
    %c0_3 = arith.constant 0 : index
    %c0_4 = arith.constant 0 : index
    %4 = vector.load %arg3[%c0_3, %c0_4] : memref<128x128xbf16, #tpu.memory_space<vmem>>, vector<128x128xbf16>
    tpu.vector_store %arg3[%c0_3, %c0_4], %3 {strides = array<i32>} : memref<128x128xbf16, #tpu.memory_space<vmem>>, vector<128x128xbf16>,
    return
  }
  func.func @transform_0(%arg0: i32) -> (i32, i32) {
    %c0_i32 = arith.constant 0 : i32
    %c0_i32_0 = arith.constant 0 : i32
    return %arg0, %c0_i32 : i32, i32
  }
  func.func @transform_1(%arg0: i32) -> (i32, i32) {
    %c0_i32 = arith.constant 0 : i32
    %c0_i32_0 = arith.constant 0 : i32
    %c0_i32_1 = arith.constant 0 : i32
    return %c0_i32, %c0_i32_0 : i32, i32
  }
  func.func @transform_2(%arg0: i32) -> (i32, i32) {
    %c0_i32 = arith.constant 0 : i32
    %c0_i32_0 = arith.constant 0 : i32
    return %arg0, %c0_i32 : i32, i32
  }
}

</mosaic_0001>

<bundles_post_ra>
// kernel: tpu_custom_call.1
= control target key start
LH: loop header
LB: loop body
LE: loop exit
PB: predicated region body
PF: predicated region fallthrough
CT: control target
= control target key end

     0   :  { %7 = vsyncpa [#allocation3], 0  ;;  %s681_s0 = inlined_call_operand.hbm [shape: bf16[128,128], index: 0, kind: input, shape index: {}]   ;;  %s682_s1 = inlined_call_operand.hbm [shape: bf16[128,128], index: 1, kind: input, shape index: {}]   ;;  %s683_s2 = inlined_call_operand.hbm [shape: bf16[128,128], index: 2, kind: output, shape index: {}]  }
   0x1   :  { %8 = vsyncpa [#allocation6], 0 }
   0x2   :  { %9 = vsyncpa [#allocation4], 0  ;;  %s616_s9 = smov [#allocation2]   ;;  %s544_s13 = scalar_lea.hbm %s681_s0, 1024 }
   0x3   :  { %s15_s10 = sshll.u32 %s616_s9, 4  ;;  %p545_p0 = scmp.ne.s32.totalorder %s681_s0, %s544_s13  ;;  %s16_s10 = int_to_ptr.vmem [resolvable:$true] %s15_s10 }
   0x4   :  { %p548_p1 = scmp.lt.u32.totalorder %s544_s13, %s681_s0 }
   0x6   :  { %p550_p2 = pnand %p548_p1, %p545_p0 }
   0x8   :  { %553 = shalt.err (!%p550_p2)
}
   0x9   :  { %s554_s18 = scalar_lea.vmem %s16_s10, 1024  ;;  %p559_p4 = scmp.lt.s32.totalorder %s16_s10, %s16_s10 }
   0xa   :  { %p555_p3 = scmp.ne.s32.totalorder %s16_s10, %s554_s18  ;;  %p560_p5 = scmp.lt.s32.totalorder %s554_s18, %s554_s18 }
   0xc   :  { %p561_p6 = por %p560_p5, %p559_p4 }
   0xe   :  { %p562_p7 = pnand %p561_p6, %p555_p3 }
  0x10   :  { %565 = shalt.err (!%p562_p7)
}
  0x11   :  { %s617_s19 = smov 64   ;;  %s618_s20 = smov 4  }
  0x12   :  { %21 = dma.hbm_to_vmem [thread:$0]  %s681_s0, 1024, %s16_s10, [#allocation3], %s617_s19, %s617_s19, %s618_s20  }
  0x13   :  { %s619_s23 = smov [#allocation5]   ;;  %s566_s27 = scalar_lea.hbm %s682_s1, 1024 }
  0x14   :  { %s27_s24 = sshll.u32 %s619_s23, 4  ;;  %p567_p8 = scmp.ne.s32.totalorder %s682_s1, %s566_s27  ;;  %s28_s24 = int_to_ptr.vmem [resolvable:$true] %s27_s24 }
  0x15   :  { %p570_p9 = scmp.lt.u32.totalorder %s566_s27, %s682_s1 }
  0x17   :  { %p572_p10 = pnand %p570_p9, %p567_p8 }
  0x19   :  { %575 = shalt.err (!%p572_p10)
}
  0x1a   :  { %s576_s4 = scalar_lea.vmem %s28_s24, 1024  ;;  %p581_p12 = scmp.lt.s32.totalorder %s28_s24, %s28_s24 }
  0x1b   :  { %p577_p11 = scmp.ne.s32.totalorder %s28_s24, %s576_s4  ;;  %p582_p13 = scmp.lt.s32.totalorder %s576_s4, %s576_s4 }
  0x1d   :  { %p583_p0 = por %p582_p13, %p581_p12 }
  0x1f   :  { %p584_p1 = pnand %p583_p0, %p577_p11 }
  0x21   :  { %587 = shalt.err (!%p584_p1)
}
  0x22   :  { %33 = dma.hbm_to_vmem [thread:$0]  %s682_s1, 1024, %s28_s24, [#allocation6], %s617_s19, %s617_s19, %s618_s20  }
  0x23   :  { %610 = dma.done.wait [#allocation3], 1024  }
  0x24   :  { %611 = vsyncadd [#allocation3], 4294966272 }
  0x25   :  { %612 = dma.done.wait [#allocation6], 1024  }
  0x26   :  { %613 = vsyncadd [#allocation6], 4294966272  ;;  %v528_v0 = vld [vmem:[#allocation5] sm:$0xff]   ;;  %v529_v1 = vld [vmem:[#allocation5 + $0x8] sm:$0xff]   ;;  %s620_s1 = smov [#allocation7]  }
  0x27   :  { %475 = vmatprep.subr.bf16.mxu0 %v528_v0  ;;  %507 = vmatprep.subr.bf16.mxu1 %v528_v0  ;;  %v530_v2 = vld [vmem:[#allocation5 + $0x10] sm:$0xff]   ;;  %v531_v3 = vld [vmem:[#allocation5 + $0x18] sm:$0xff]   ;;  %v536_v4 = vld [vmem:[#allocation2] sm:$0xff]   ;;  %s351_s6 = sshll.u32 %s620_s1, 4  ;;  %s352_s6 = int_to_ptr.vmem [resolvable:$true] %s351_s6 }
  0x28   :  { %476 = vmatpush3.bf16.msra.mxu0 %v528_v0  ;;  %515 = vmatpush3.bf16.msra.mxu1 %v528_v0  ;;  %v537_v5 = vld [vmem:[#allocation2 + $0x20] sm:$0xff]   ;;  %v533_v7 = vld [vmem:[#allocation5 + $0x28] sm:$0xff]   ;;  %v534_v8 = vld [vmem:[#allocation5 + $0x30] sm:$0xff]   ;;  %s588_s7 = scalar_lea.vmem %s352_s6, 1024  ;;  %p593_p3 = scmp.lt.s32.totalorder %s352_s6, %s352_s6 }
  0x29   :  { %477 = vmatprep.subr.bf16.mxu0 %v529_v1  ;;  %508 = vmatprep.subr.bf16.mxu1 %v529_v1  ;;  %v532_v6 = vld [vmem:[#allocation5 + $0x20] sm:$0xff]   ;;  %v535_v9 = vld [vmem:[#allocation5 + $0x38] sm:$0xff]   ;;  %v538_v10 = vld [vmem:[#allocation2 + $0x8] sm:$0xff]   ;;  %p589_p2 = scmp.ne.s32.totalorder %s352_s6, %s588_s7  ;;  %p594_p4 = scmp.lt.s32.totalorder %s588_s7, %s588_s7 }
  0x2a   :  { %491 = vmatprep.mubr.bf16.mxu0 %v536_v4  ;;  %499 = vmatprep.mubr.bf16.mxu1 %v537_v5  ;;  %v539_v11 = vld [vmem:[#allocation2 + $0x28] sm:$0xff]   ;;  %v540_v12 = vld [vmem:[#allocation2 + $0x10] sm:$0xff]   ;;  %v542_v14 = vld [vmem:[#allocation2 + $0x18] sm:$0xff]  }
  0x2b   :  { %v541_v13 = vld [vmem:[#allocation2 + $0x30] sm:$0xff]   ;;  %v543_v15 = vld [vmem:[#allocation2 + $0x38] sm:$0xff]   ;;  %p595_p5 = por %p594_p4, %p593_p3 }
  0x2c   :  { %478 = vmatpush3.bf16.msra.mxu0 %v529_v1  ;;  %516 = vmatpush3.bf16.msra.mxu1 %v529_v1 }
  0x2d   :  { %479 = vmatprep.subr.bf16.mxu0 %v530_v2  ;;  %509 = vmatprep.subr.bf16.mxu1 %v530_v2  ;;  %p596_p6 = pnand %p595_p5, %p589_p2 }
  0x30   :  { %480 = vmatpush3.bf16.msra.mxu0 %v530_v2  ;;  %517 = vmatpush3.bf16.msra.mxu1 %v530_v2 }
  0x31   :  { %481 = vmatprep.subr.bf16.mxu0 %v531_v3  ;;  %510 = vmatprep.subr.bf16.mxu1 %v531_v3 }
  0x34   :  { %482 = vmatpush3.bf16.msra.mxu0 %v531_v3  ;;  %518 = vmatpush3.bf16.msra.mxu1 %v531_v3 }
  0x35   :  { %483 = vmatprep.subr.bf16.mxu0 %v532_v6  ;;  %511 = vmatprep.subr.bf16.mxu1 %v532_v6 }
  0x38   :  { %484 = vmatpush3.bf16.msra.mxu0 %v532_v6  ;;  %519 = vmatpush3.bf16.msra.mxu1 %v532_v6 }
  0x39   :  { %485 = vmatprep.subr.bf16.mxu0 %v533_v7  ;;  %512 = vmatprep.subr.bf16.mxu1 %v533_v7 }
  0x3c   :  { %486 = vmatpush3.bf16.msra.mxu0 %v533_v7  ;;  %520 = vmatpush3.bf16.msra.mxu1 %v533_v7 }
  0x3d   :  { %487 = vmatprep.subr.bf16.mxu0 %v534_v8  ;;  %513 = vmatprep.subr.bf16.mxu1 %v534_v8 }
  0x40   :  { %488 = vmatpush3.bf16.msra.mxu0 %v534_v8  ;;  %521 = vmatpush3.bf16.msra.mxu1 %v534_v8 }
  0x41   :  { %489 = vmatprep.subr.bf16.mxu0 %v535_v9  ;;  %514 = vmatprep.subr.bf16.mxu1 %v535_v9 }
  0x44   :  { %490 = vmatpush3.bf16.msra.mxu0 %v535_v9  ;;  %522 = vmatpush3.bf16.msra.mxu1 %v535_v9 }
  0x47   :  { %492 = vmatmul.mubr.bf16.vlgmr.msra.gmra.mrb[0].mxu0 %v538_v10  ;;  %500 = vmatmul.mubr.bf16.vlgmr.msra.gmra.mrb[0].mxu1 %v539_v11 }
  0x48   :  { %495 = vmatprep.mubr.bf16.mxu0 %v540_v12  ;;  %503 = vmatprep.mubr.bf16.mxu1 %v541_v13 }
  0x4f   :  { %496 = vmatmul.mubr.bf16.gmra.mrb[4].mxu0 %v542_v14  ;;  %504 = vmatmul.mubr.bf16.gmra.mrb[4].mxu1 %v543_v15 }
 0x11a   :  { %v493_v16 = vpop.f32.mrb[0].mxu0  ;;  %v501_v17 = vpop.f32.mrb[0].mxu1 }
 0x11b   :  { %v203_v18 = vpop.f32.mrb[1].mxu0  ;;  %v235_v19 = vpop.f32.mrb[1].mxu1 }
 0x11c   :  { %v494_v20 = vpop.f32.mrb[2].mxu0  ;;  %v502_v21 = vpop.f32.mrb[2].mxu1 }
 0x11d   :  { %v420_v22 = vpack.c.bf16 %v494_v20, %v493_v16  ;;  %v440_v23 = vpack.c.bf16 %v502_v21, %v501_v17  ;;  %v206_v24 = vpop.f32.mrb[3].mxu0  ;;  %v238_v25 = vpop.f32.mrb[3].mxu1 }
 0x11e   :  { %v415_v26 = vpack.c.bf16 %v206_v24, %v203_v18  ;;  %v435_v27 = vpack.c.bf16 %v238_v25, %v235_v19 }
 0x11f   :  { %452 = vst [vmem:[#allocation7 + $0x8] sm:$0xff] %v420_v22   ;;  %456 = vst [vmem:[#allocation7 + $0x28] sm:$0xff] %v440_v23  }
 0x120   :  { %416 = vst [vmem:[#allocation7] sm:$0xff] %v415_v26   ;;  %455 = vst [vmem:[#allocation7 + $0x20] sm:$0xff] %v435_v27  }
 0x122   :  { %v497_v28 = vpop.f32.mrb[4].mxu0  ;;  %v505_v29 = vpop.f32.mrb[4].mxu1 }
 0x123   :  { %v219_v30 = vpop.f32.mrb[5].mxu0  ;;  %v251_v31 = vpop.f32.mrb[5].mxu1 }
 0x124   :  { %v498_v32 = vpop.f32.mrb[6].mxu0  ;;  %v506_v33 = vpop.f32.mrb[6].mxu1 }
 0x125   :  { %v430_v34 = vpack.c.bf16 %v498_v32, %v497_v28  ;;  %v450_v35 = vpack.c.bf16 %v506_v33, %v505_v29  ;;  %v222_v36 = vpop.f32.mrb[7].mxu0  ;;  %v254_v37 = vpop.f32.mrb[7].mxu1 }
 0x126   :  { %v425_v38 = vpack.c.bf16 %v222_v36, %v219_v30  ;;  %v445_v39 = vpack.c.bf16 %v254_v37, %v251_v31 }
 0x127   :  { %454 = vst [vmem:[#allocation7 + $0x18] sm:$0xff] %v430_v34   ;;  %458 = vst [vmem:[#allocation7 + $0x38] sm:$0xff] %v450_v35  }
 0x128   :  { %453 = vst [vmem:[#allocation7 + $0x10] sm:$0xff] %v425_v38   ;;  %457 = vst [vmem:[#allocation7 + $0x30] sm:$0xff] %v445_v39  }
 0x129   :  { %599 = shalt.err (!%p596_p6)
}
 0x12a   :  { %s600_s10 = scalar_lea.hbm %s683_s2, 1024 }
 0x12b   :  { %p601_p7 = scmp.ne.s32.totalorder %s683_s2, %s600_s10  ;;  %p604_p8 = scmp.lt.u32.totalorder %s600_s10, %s683_s2 }
 0x12d   :  { %p606_p9 = pnand %p604_p8, %p601_p7 }
 0x12f   :  { %609 = shalt.err (!%p606_p9)
}
 0x130   :  { %357 = dma.vmem_to_hbm [thread:$0]  %s352_s6, 1024, %s683_s2, [#allocation4], %s617_s19, %s617_s19, %s618_s20  }
 0x131   :  { %614 = dma.done.wait [#allocation4], 1024  }
 0x132   :  { %615 = vsyncadd [#allocation4], 4294966272 }
 0x133   :  { %361 = vsyncpa [#allocation3], 1 }
 0x134   :  { %362 = vsyncpa [#allocation6], 1 }
 0x135   :  { %363 = vsyncpa [#allocation4], 1 }

</bundles_post_ra>
